<compile_context>
chip_gen: v7x
topology: tpu7x:2x2x1
jax: 0.10.0
libtpu: 0.0.40
codegen_flags: <defaults>
</compile_context>

<pallas_src>
import functools

import jax
import jax.numpy as jnp
from jax.experimental import pallas as pl
from jax.experimental.pallas import tpu as pltpu

BN_EPS = 1e-5
LANE = 128


def _round_up(a, b):
    return (a + b - 1) // b * b


# ---------------------- kernel 1: one squeeze (tiled GAP) ----------------------
def _chunk(x_ref, c):
    """128-lane slab c of the current (N, tc, thw) block, promoted to f32."""
    return x_ref[:, :, c * LANE:(c + 1) * LANE].astype(jnp.float32)


def _masked_tail_chunk(x_ref, c, rem):
    """Chunk c with lanes >= rem zeroed (rem static).  Masks Pallas' unspecified
    padding in the partial tail HW block so it cannot corrupt the sum."""
    v = _chunk(x_ref, c)
    lane = jax.lax.broadcasted_iota(jnp.int32, v.shape, 2)
    return jnp.where(lane < rem, v, 0.0)


def _reg_partial(x_ref, n_valid):
    """Register-resident sum of the first n_valid lanes of this block: (N, tc, 128)."""
    n_full, rem = divmod(n_valid, LANE)
    p = None
    for c in range(n_full):
        v = _chunk(x_ref, c)
        p = v if p is None else p + v
    if rem:
        v = _masked_tail_chunk(x_ref, n_full, rem)
        p = v if p is None else p + v
    return p


def _acc_chunks(x_ref, acc_ref, n_valid):
    """Fallback for large N*tc: accumulate chunk-by-chunk directly into VMEM."""
    n_full, rem = divmod(n_valid, LANE)
    for c in range(n_full):
        acc_ref[...] += _chunk(x_ref, c)
    if rem:
        acc_ref[...] += _masked_tail_chunk(x_ref, n_full, rem)


def _squeeze_kernel(x_ref, s_ref, acc_ref, *, thw, n_hw_blocks, valid_last,
                    inv_hw, use_reg_acc):
    # x_ref  : (N, tc, thw) block of x (thw a multiple of 128)
    # s_ref  : (1, N, tc)   per-channel-block output (resident across the HW axis)
    # acc_ref: (N, tc, 128) f32 accumulator; cross-lane (XLU) reduce deferred to finalize
    j = pl.program_id(1)
    last = n_hw_blocks - 1

    def _emit(total):
        s_ref[...] = (jnp.sum(total, axis=-1) * inv_hw)[None, :, :].astype(s_ref.dtype)

    if n_hw_blocks == 1:
        # Whole HW row in one block: skip the VMEM accumulator round-trip.
        if use_reg_acc:
            _emit(_reg_partial(x_ref, valid_last))
        else:
            acc_ref[...] = jnp.zeros_like(acc_ref)
            _acc_chunks(x_ref, acc_ref, valid_last)
            _emit(acc_ref[...])
        return

    if use_reg_acc:
        # One VMEM accumulator update per grid step (register partial sums).
        @pl.when(j == 0)
        def _first():
            acc_ref[...] = _reg_partial(x_ref, thw)

        @pl.when((j > 0) & (j < last))
        def _middle():
            acc_ref[...] += _reg_partial(x_ref, thw)

        @pl.when(j == last)
        def _tail():
            _emit(acc_ref[...] + _reg_partial(x_ref, valid_last))
    else:
        @pl.when(j == 0)
        def _init():
            acc_ref[...] = jnp.zeros_like(acc_ref)

        if valid_last < thw:
            @pl.when(j < last)
            def _full_blocks():
                _acc_chunks(x_ref, acc_ref, thw)

            @pl.when(j == last)
            def _tail_block():
                _acc_chunks(x_ref, acc_ref, valid_last)
        else:
            _acc_chunks(x_ref, acc_ref, thw)

        @pl.when(j == last)
        def _finalize():
            _emit(acc_ref[...])


# --------------------- kernel 2: K excites on the squeeze ----------------------
def _excite_kernel(s_ref, w1_ref, w2_ref, g1_ref, b1_ref, g2_ref, b2_ref,
                   out_ref, *, fuse_type, num_excitations, weights_shared):
    # s: (N, C); w1: (C, Kw*Cr) [all Kw fc1's batched]; w2: (Kw, Cr, C)
    # g1/b1: (1, Kw*Cr); g2/b2: (Kw, C); out: (N, K*C) for 'cat', else (N, C)
    s = s_ref[...].astype(jnp.float32)                        # (N, C)
    K = num_excitations
    Kw, Cr, C = w2_ref.shape                                  # Kw == 1 if shared

    # fc1 of all Kw excites as one MXU call; bn1 uses training-mode batch stats
    # (biased variance).  Each excite owns a disjoint column range, so per-column
    # stats of the batched activations equal the per-excite stats.
    h = jnp.dot(s, w1_ref[...].astype(jnp.float32),
                preferred_element_type=jnp.float32)           # (N, Kw*Cr)
    mu1 = jnp.mean(h, axis=0, keepdims=True)
    var1 = jnp.mean((h - mu1) ** 2, axis=0, keepdims=True)
    h = (g1_ref[...].astype(jnp.float32) * (h - mu1) * jax.lax.rsqrt(var1 + BN_EPS)
         + b1_ref[...].astype(jnp.float32))
    h = jnp.maximum(h, 0.0)                                   # relu

    outs = []
    for k in range(Kw):                                       # Kw tiny, static
        hk = h[:, k * Cr:(k + 1) * Cr]                        # (N, Cr)
        z = jnp.dot(hk, w2_ref[k].astype(jnp.float32),
                    preferred_element_type=jnp.float32)       # (N, C)
        mu2 = jnp.mean(z, axis=0, keepdims=True)
        var2 = jnp.mean((z - mu2) ** 2, axis=0, keepdims=True)
        z = (g2_ref[k].astype(jnp.float32)[None, :] * (z - mu2)
             * jax.lax.rsqrt(var2 + BN_EPS)
             + b2_ref[k].astype(jnp.float32)[None, :])
        e = jax.nn.sigmoid(z)                                 # (N, C)
        outs.append(e * s)                 # GAP(e * x) == e * GAP(x) == e * s

    if fuse_type == 'cat':
        for k in range(K):
            out_ref[:, k * C:(k + 1) * C] = outs[k % Kw].astype(out_ref.dtype)
    elif weights_shared:                                      # all K branches identical
        scale = 1.0 if fuse_type == 'avg' else float(K)
        out_ref[...] = (outs[0] * scale).astype(out_ref.dtype)
    else:
        acc = outs[0]
        for k in range(1, K):
            acc = acc + outs[k]
        if fuse_type == 'avg':
            acc = acc * (1.0 / float(K))
        out_ref[...] = acc.astype(out_ref.dtype)


# ----------------------------------- wrapper -----------------------------------
def osme_block_pallas(x, params, fuse_type='cat', weights_shared=False,
                      max_block_bytes=8 << 20):
    """x: (N, C, H, W) float32/bfloat16 (NCHW, like PyTorch). Returns (N, out_C, 1, 1)."""
    assert fuse_type in ('cat', 'avg', 'sum')
    N, C, H, W = x.shape
    HW = H * W
    w1, w2 = params['w1'], params['w2']            # (K, C, Cr), (K, Cr, C)
    g1, b1 = params['g1'], params['b1']            # (K, Cr)
    g2, b2 = params['g2'], params['b2']            # (K, C)
    K, _, Cr = w1.shape
    out_C = K * C if fuse_type == 'cat' else C

    itemsize = jnp.dtype(x.dtype).itemsize
    sub = max(8, 32 // itemsize)     # sublane multiple: f32 -> 8, bf16 -> 16, int8 -> 32

    # ---- channel tiling: aim for >= 2 blocks on the parallel axis (v7x megacore),
    #      keeping tc a multiple of the dtype's sublane tile (or equal to C). ----
    if C <= sub:
        tc = C                                     # full-dim block: always legal
    elif C <= 2 * LANE:
        tc = min(_round_up(pl.cdiv(C, 2), sub), _round_up(C, sub))
    else:
        tc = LANE
    c_blocks = pl.cdiv(C, tc)

    # ---- generation-aware VMEM budget (v7x: 64 MiB/TC vs 128 MiB on v5e/v6e) ----
    try:
        vmem_cap = int(pltpu.get_tpu_info().vmem_capacity_bytes)
    except Exception:
        vmem_cap = 64 << 20                        # conservative (v7x per-core)
    acc_bytes = N * tc * LANE * 4
    out_blk_bytes = N * tc * 4
    scoped_target = min(vmem_cap // 2, 40 << 20)
    x_budget = (scoped_target - acc_bytes - 2 * out_blk_bytes - (4 << 20)) // 3
    x_budget = max(min(max_block_bytes, x_budget), N * tc * LANE * itemsize)

    # ---- spatial tiling: 128-lane multiples, biggest block within the budget ----
    hw_cap = _round_up(HW, LANE)
    thw = LANE
    while thw * 2 <= hw_cap and N * tc * (thw * 2) * itemsize <= x_budget:
        thw *= 2
    hw_blocks = pl.cdiv(HW, thw)
    valid_last = HW - (hw_blocks - 1) * thw        # valid lanes in the tail HW block

    x_r = x.reshape(N, C, HW)                      # contiguous reshape: no HBM copy

    # (N, tc, 128) f32 register partial must stay within ~32 vregs
    use_reg_acc = N * tc <= 256

    # triple-buffer the streamed input when the grid is long enough to pipeline
    n_x_buf = 2
    x_spec = pl.BlockSpec((N, tc, thw), lambda i, j: (0, i, j))
    if c_blocks * hw_blocks >= 3:
        try:
            x_spec = pl.BlockSpec((N, tc, thw), lambda i, j: (0, i, j),
                                  pipeline_mode=pl.Buffered(3))
            n_x_buf = 3
        except TypeError:      # BlockSpec without pipeline_mode: keep double buffering
            pass

    x_block_bytes = N * tc * thw * itemsize
    vmem_limit = int(min(n_x_buf * x_block_bytes + acc_bytes + 2 * out_blk_bytes
                         + (8 << 20), vmem_cap))

    squeeze = functools.partial(
        _squeeze_kernel, thw=thw, n_hw_blocks=hw_blocks, valid_last=valid_last,
        inv_hw=1.0 / HW, use_reg_acc=use_reg_acc)

    s_stacked = pl.pallas_call(
        squeeze,
        out_shape=jax.ShapeDtypeStruct((c_blocks, N, tc), jnp.float32),
        grid=(c_blocks, hw_blocks),                # (parallel, reduction last)
        in_specs=[x_spec],
        out_specs=pl.BlockSpec((1, N, tc), lambda i, j: (i, 0, 0)),
        scratch_shapes=[pltpu.VMEM((N, tc, LANE), jnp.float32)],
        compiler_params=pltpu.CompilerParams(
            dimension_semantics=("parallel", "arbitrary"),
            vmem_limit_bytes=vmem_limit),
    )(x_r)

    # (c_blocks, N, tc) -> (N, C); trailing columns of a partial channel block hold
    # unspecified data and are sliced off here (they never mix with real channels).
    s = jnp.transpose(s_stacked, (1, 0, 2)).reshape(N, c_blocks * tc)[:, :C]

    # ---- excites (tiny). The PyTorch ModuleList reuses ONE excite instance, so with
    #      weights_shared=True the excite is computed once and replicated K times. ----
    if weights_shared:
        w1_u, w2_u = w1[:1], w2[:1]
        g1_u, b1_u, g2_u, b2_u = g1[:1], b1[:1], g2[:1], b2[:1]
    else:
        w1_u, w2_u, g1_u, b1_u, g2_u, b2_u = w1, w2, g1, b1, g2, b2
    Kw = w1_u.shape[0]

    w1_cat = jnp.transpose(w1_u, (1, 0, 2)).reshape(C, Kw * Cr)   # batched fc1 weights
    g1_cat = g1_u.reshape(1, Kw * Cr)
    b1_cat = b1_u.reshape(1, Kw * Cr)

    excite = functools.partial(_excite_kernel, fuse_type=fuse_type,
                               num_excitations=K, weights_shared=weights_shared)
    out = pl.pallas_call(
        excite,
        out_shape=jax.ShapeDtypeStruct((N, out_C), jnp.float32),
        grid=(1,),
        in_specs=[
            pl.BlockSpec((N, C), lambda i: (0, 0)),            # s
            pl.BlockSpec((C, Kw * Cr), lambda i: (0, 0)),      # batched fc1 weights
            pl.BlockSpec((Kw, Cr, C), lambda i: (0, 0, 0)),    # fc2 weights
            pl.BlockSpec((1, Kw * Cr), lambda i: (0, 0)),      # bn1 gamma
            pl.BlockSpec((1, Kw * Cr), lambda i: (0, 0)),      # bn1 beta
            pl.BlockSpec((Kw, C), lambda i: (0, 0)),           # bn2 gamma
            pl.BlockSpec((Kw, C), lambda i: (0, 0)),           # bn2 beta
        ],
        out_specs=pl.BlockSpec((N, out_C), lambda i: (0, 0)),
        compiler_params=pltpu.CompilerParams(dimension_semantics=("arbitrary",)),
    )(s, w1_cat, w2_u, g1_cat, b1_cat, g2_u, b2_u)

    # PyTorch fast_global_avg_pool_2d(flatten=False) yields (N, C, 1, 1); cat on dim 1.
    return out.reshape(N, out_C, 1, 1)


# ----------------------------- params & reference ------------------------------
def make_params(key, in_channels, reduction=16, num_excitations=2):
    """Deterministic synthetic parameters (shapes from OSMEBlock.__init__).

    The PyTorch ModuleList reuses ONE excitation module instance, so the same
    weights are replicated across the K excites."""
    C = in_channels
    Cr = C // reduction
    k1, k2, k3, k4, k5, k6 = jax.random.split(key, 6)
    # conv fc1 weight (Cr, C, 1, 1) -> stored transposed (C, Cr) for s @ W1
    w1 = jax.random.normal(k1, (C, Cr), jnp.float32) * 0.1
    # conv fc2 weight (C, Cr, 1, 1) -> stored transposed (Cr, C) for h @ W2
    w2 = jax.random.normal(k2, (Cr, C), jnp.float32) * 0.1
    g1 = 1.0 + 0.1 * jax.random.normal(k3, (Cr,), jnp.float32)
    b1 = 0.1 * jax.random.normal(k4, (Cr,), jnp.float32)
    g2 = 1.0 + 0.1 * jax.random.normal(k5, (C,), jnp.float32)
    b2 = 0.1 * jax.random.normal(k6, (C,), jnp.float32)

    def rep(a):  # shared instance -> identical params for every excite
        return jnp.stack([a] * num_excitations, axis=0)

    return {'w1': rep(w1), 'w2': rep(w2), 'g1': rep(g1), 'b1': rep(b1),
            'g2': rep(g2), 'b2': rep(b2)}


def osme_block_reference(x, params, fuse_type='cat'):
    """Pure-JAX reference mirroring the PyTorch forward (for validation)."""
    N, C, H, W = x.shape
    x = x.astype(jnp.float32)
    s = jnp.mean(x, axis=(2, 3))                              # (N, C)
    K = params['w1'].shape[0]
    outs = []
    for k in range(K):
        h = s @ params['w1'][k]
        mu1 = h.mean(0, keepdims=True)
        var1 = ((h - mu1) ** 2).mean(0, keepdims=True)
        h = params['g1'][k] * (h - mu1) / jnp.sqrt(var1 + BN_EPS) + params['b1'][k]
        h = jnp.maximum(h, 0.0)
        z = h @ params['w2'][k]
        mu2 = z.mean(0, keepdims=True)
        var2 = ((z - mu2) ** 2).mean(0, keepdims=True)
        z = params['g2'][k] * (z - mu2) / jnp.sqrt(var2 + BN_EPS) + params['b2'][k]
        e = jax.nn.sigmoid(z)
        outs.append(jnp.mean(e[:, :, None, None] * x, axis=(2, 3)))
    if fuse_type == 'cat':
        out = jnp.concatenate(outs, axis=1)
    elif fuse_type == 'avg':
        out = jnp.stack(outs).mean(0)
    else:
        out = jnp.stack(outs).sum(0)
    return out.reshape(N, out.shape[1], 1, 1)


if __name__ == "__main__":
    key = jax.random.PRNGKey(0)

    # Primary: small, module-consistent shape (in_channels >= reduction).
    # C=32 -> tc=16, 2 parallel channel blocks; HW=256 -> single HW block (no mask).
    N, C, H, W = 2, 32, 16, 16
    reduction, num_excitations = 16, 2
    kx, kp = jax.random.split(key)
    x = jax.random.normal(kx, (N, C, H, W), jnp.float32)
    params = make_params(kp, C, reduction, num_excitations)

    for fuse_type in ('cat', 'avg', 'sum'):
        out = jax.block_until_ready(
            osme_block_pallas(x, params, fuse_type, weights_shared=True))
        ref = osme_block_reference(x, params, fuse_type)
        assert out.shape == ref.shape, (out.shape, ref.shape)
        assert jnp.allclose(out, ref, atol=1e-4, rtol=1e-4), \
            float(jnp.max(jnp.abs(out - ref)))

    # General (distinct-weights) excite code path on the same inputs.
    out_g = jax.block_until_ready(
        osme_block_pallas(x, params, 'cat', weights_shared=False))
    ref_g = osme_block_reference(x, params, 'cat')
    assert jnp.allclose(out_g, ref_g, atol=1e-4, rtol=1e-4), \
        float(jnp.max(jnp.abs(out_g - ref_g)))

    # Secondary: 3 channel blocks, HW=196 split into 2 HW steps (small block budget),
    # in-kernel tail masking (valid_last=68), Buffered(3) input pipelining.
    N2, C2, H2, W2 = 2, 384, 14, 14
    k2x, k2p = jax.random.split(jax.random.PRNGKey(1))
    x2 = jax.random.normal(k2x, (N2, C2, H2, W2), jnp.float32)
    params2 = make_params(k2p, C2, reduction, num_excitations)
    out2 = jax.block_until_ready(
        osme_block_pallas(x2, params2, 'cat', weights_shared=True,
                          max_block_bytes=128 * 1024))
    ref2 = osme_block_reference(x2, params2, 'cat')
    assert jnp.allclose(out2, ref2, atol=1e-4, rtol=1e-4), \
        float(jnp.max(jnp.abs(out2 - ref2)))

    # bf16 input: exercises the 16-sublane channel rounding (C=48 -> tc=32, 2 blocks,
    # partial channel tail) and a single HW block smaller than 128 lanes (HW=100).
    N3, C3, H3, W3 = 2, 48, 10, 10
    k3x, k3p = jax.random.split(jax.random.PRNGKey(2))
    x3 = jax.random.normal(k3x, (N3, C3, H3, W3), jnp.float32).astype(jnp.bfloat16)
    params3 = make_params(k3p, C3, reduction, num_excitations)
    out3 = jax.block_until_ready(
        osme_block_pallas(x3, params3, 'cat', weights_shared=True))
    ref3 = osme_block_reference(x3, params3, 'cat')
    assert jnp.allclose(out3, ref3, atol=2e-3, rtol=2e-3), \
        float(jnp.max(jnp.abs(out3 - ref3)))

    print("KERNEL_OK")
</pallas_src>

<mosaic_0001>
module attributes {stable_mosaic.version = 11 : i64} {
  func.func @_squeeze_kernel(%arg0: i32, %arg1: i32, %arg2: memref<2x16x256xf32, #tpu.memory_space<vmem>>, %arg3: memref<1x2x16xf32, #tpu.memory_space<vmem>>, %arg4: memref<2x16x128xf32, #tpu.memory_space<vmem>>) attributes {dimension_semantics = [#tpu.dimension_semantics<parallel>, #tpu.dimension_semantics<arbitrary>], iteration_bounds = array<i64: 2, 1>, scalar_prefetch = 0 : i64, scratch_operands = 1 : i64, tpu.core_type = #tpu.core_type<tc>, window_params = [{transform_indices = @transform_0, window_bounds = array<i64: 2, 16, 256>}, {transform_indices = @transform_1, window_bounds = array<i64: 1, 2, 16>}]} {
    %c0 = arith.constant 0 : index
    %c0_0 = arith.constant 0 : index
    %c0_1 = arith.constant 0 : index
    %0 = vector.load %arg2[%c0, %c0_0, %c0_1] : memref<2x16x256xf32, #tpu.memory_space<vmem>>, vector<2x16x128xf32>
    %c0_2 = arith.constant 0 : index
    %c0_3 = arith.constant 0 : index
    %c128 = arith.constant 128 : index
    %1 = vector.load %arg2[%c0_2, %c0_3, %c128] : memref<2x16x256xf32, #tpu.memory_space<vmem>>, vector<2x16x128xf32>
    %2 = arith.addf %0, %1 : vector<2x16x128xf32>
    %cst = arith.constant dense<0.000000e+00> : vector<2x16xf32>
    %3 = vector.multi_reduction <add>, %2, %cst [2] : vector<2x16x128xf32> to vector<2x16xf32>
    %cst_4 = arith.constant 3.906250e-03 : f32
    %4 = vector.broadcast %cst_4 : f32 to vector<2x16xf32>
    %5 = arith.mulf %3, %4 : vector<2x16xf32>
    %6 = vector.shape_cast %5 : vector<2x16xf32> to vector<1x2x16xf32>
    %c0_5 = arith.constant 0 : index
    %c0_6 = arith.constant 0 : index
    %c0_7 = arith.constant 0 : index
    %7 = vector.load %arg3[%c0_5, %c0_6, %c0_7] : memref<1x2x16xf32, #tpu.memory_space<vmem>>, vector<1x2x16xf32>
    tpu.vector_store %arg3[%c0_5, %c0_6, %c0_7], %6 {strides = array<i32>} : memref<1x2x16xf32, #tpu.memory_space<vmem>>, vector<1x2x16xf32>,
    return
  }
  func.func @transform_0(%arg0: i32, %arg1: i32) -> (i32, i32, i32) {
    %c0_i32 = arith.constant 0 : i32
    %c0_i32_0 = arith.constant 0 : i32
    return %c0_i32, %arg0, %arg1 : i32, i32, i32
  }
  func.func @transform_1(%arg0: i32, %arg1: i32) -> (i32, i32, i32) {
    %c0_i32 = arith.constant 0 : i32
    %c0_i32_0 = arith.constant 0 : i32
    %c0_i32_1 = arith.constant 0 : i32
    return %arg0, %c0_i32, %c0_i32_0 : i32, i32, i32
  }
}

</mosaic_0001>

<bundles_post_ra>
// kernel: tpu_custom_call.1
= control target key start
LH: loop header
LB: loop body
LE: loop exit
PB: predicated region body
PF: predicated region fallthrough
CT: control target
= control target key end

     0   :  { %6 = vsyncpa [#allocation4], 0  ;;  %s667_s0 = inlined_call_operand.hbm [shape: f32[2,32,256], index: 0, kind: input, shape index: {}]   ;;  %s668_s1 = inlined_call_operand.hbm [shape: f32[2,2,16], index: 1, kind: output, shape index: {}]  }
   0x1   :  { %8 = vsyncpa [#allocation4 + $0x1], 0 }
   0x2   :  { %9 = vsyncpa [#allocation5], 0 }
   0x3   :  { %11 = vsyncpa [#allocation5 + $0x1], 0  ;;  %s516_s6 = smov 0   ;;  %s518_s7 = smov 0  }
   0x4   :  { %s520_s8 = smov 0   ;;  %s522_s9 = smov 0  }
   0x5   :  { %s524_s10 = smov 0   ;;  %s526_s11 = smov 0  }
   0x6 LB: > { %s326_s12 = sadd.s32 4294967295, %s497_s11   ;;  %s327_s13 = sadd.s32 4294967294, %s497_s11   ;;  %s497_s11 = sphi %s526_s11, %s17_s11   ;;  %s493_s10 = sphi %s524_s10, %s677_s10   ;;  %s489_s9 = sphi %s522_s9, %s676_s9   ;;  %s485_s8 = sphi %s520_s8, %s675_s8   ;;  %s481_s7 = sphi %s518_s7, %s674_s7   ;;  %s477_s6 = sphi %s516_s6, %s673_s6  }
   0x7   : > { %s29_s14 = sadd.s32 1, %s493_s10  ;;  %s38_s15 = sadd.s32 1, %s485_s8 }
   0x8   : > { %p31_p0 = scmp.ge.s32.totalorder %s29_s14, 2  ;;  %p45_p1 = scmp.ne.s32.totalorder %s485_s8, %s481_s7 }
   0x9   : > { %p46_p2 = scmp.eq.s32.totalorder %s497_s11, 0  ;;  %p51_p3 = scmp.ne.s32.totalorder %s481_s7, %s477_s6 }
   0xa   : > { %s679_s14 = smov (%p31_p0, %s29_s14), 0  ;;  %p52_p5 = scmp.eq.s32.totalorder %s326_s12, 0 }
   0xb   : > { %p557_p4 = por %p46_p2, %p45_p1  ;;  %s33_s17 = ssub.s32 %s493_s10, %s679_s14 }
   0xc   : > { %p75_p6 = scmp.eq.s32.totalorder %s326_s12, 1  ;;  %p36_p7 = scmp.eq.s32.totalorder %s33_s17, 0 }
   0xd   : > { %p563_p8 = por %p52_p5, %p51_p3  ;;  %p81_p10 = scmp.eq.s32.totalorder %s327_s13, 1 }
   0xe   : > { %p567_p9 = por %p75_p6, %p45_p1  ;;  %p329_p12 = scmp.ge.s32.totalorder %s497_s11, 2 }
   0xf   : > { %s572_s20 = scalar_select %p36_p7, %s485_s8, %s38_s15  }
  0x10   : > { %p574_p11 = por %p81_p10, %p51_p3  ;;  %97 = sbr.rel (%p329_p12) target bundleno = 36 (0x24), region = 16 }
  0x17   : > { %s101_s22 = sand.u32 1, %s485_s8   ;;  %s344_s23 = sshll.u32 %s493_s10, 9 }
  0x18   : > { %s330_s24 = sshll.u32 %s101_s22, 6  ;;  %s114_s27 = scalar_lea.hbm %s667_s0, %s344_s23 }
  0x19   : > { %s345_s28 = scalar_select %p557_p4, [#allocation0], [#allocation9] }
  0x1a   : > { %s105_s29 = scalar_lea.vmem [#allocation3], %s330_s24  ;;  %s499_s3 = smov 1024  }
  0x1b   : > { %s127_s30 = sshll.u32 %s105_s29, 4  ;;  %s119_s2 = sld [smem:[%s345_s28]]   ;;  %s128_s30 = int_to_ptr.vmem [resolvable:$true] %s127_s30 }
  0x1c   : > { %346 = sst [smem:[#allocation8]] (%p557_p4), %s499_s3  ;;  %s500_s4 = smov 512  }
  0x1d   : > { %347 = sst [smem:[#allocation8 + $0x1]] (%p557_p4), %s500_s4  ;;  %s501_s5 = smov 2  }
  0x1e   : > { %348 = sst [smem:[#allocation8 + $0x2]] (%p557_p4), %s501_s5  ;;  %s502_s12 = smov 256  }
  0x1f   : > { %349 = sst [smem:[#allocation8 + $0x3]] (%p557_p4), %s502_s12  ;;  %s503_s15 = smov 16  }
  0x20   : > { %350 = sst [smem:[#allocation8 + $0x4]] (%p557_p4), %s502_s12  ;;  %s102_s23 = scalar_lea.sflag [#allocation4], %s101_s22 }
  0x21   : > { %s334_s13 = sshll.u32 %s119_s2, 26  ;;  %351 = sst [smem:[#allocation8 + $0x5]] (%p557_p4), %s503_s15 }
  0x22   : > { %s335_s17 = sadd.s32 134217728, %s334_s13  ;;  %s504_s24 = smov [#allocation7]  }
  0x23   : > { %352 = dma.general (%p557_p4), %s114_s27, 1024, %s128_s30, %s102_s23, %s504_s24, [#allocation8], %s335_s17, 0  }
  0x24 PF: > { %p336_p13 = scmp.ge.s32.totalorder %s497_s11, 1  ;;  %p148_p0 = scmp.lt.s32.totalorder %s497_s11, 3 }
  0x26   : > { %p149_p1 = pnand %p336_p13, %p148_p0 }
  0x27   : > { %s605_s25 = sand.u32 (!%p149_p1), 1, %s481_s7  }
  0x28   : > { %152 = sbr.rel (%p149_p1) target bundleno = 218 (0xda), region = 24  ;;  %s337_s26 = sshll.u32 (!%p149_p1), %s605_s25, 6 }
  0x29   : > { %s155_s28 = scalar_lea.sflag (!%p149_p1), [#allocation4], %s605_s25  ;;  %s158_s29 = scalar_lea.vmem (!%p149_p1), [#allocation3], %s337_s26 }
  0x2f   : > { %468 = dma.done.wait (%p563_p8), %s155_s28, 1024  }
  0x30   : > { %470 = vsyncadd (%p563_p8), %s155_s28, 4294966272  ;;  %v181_v0 = vld [vmem:[%s158_s29 + $0x20] sm:$0xff]  ;;  %v185_v1 = vld [vmem:[%s158_s29 + $0x28] sm:$0xff]  ;;  %v207_v12 = vlaneseq  ;;  %s338_s16 = sshll.u32 %s605_s25, 1  ;;  %vm218_vm0 = vcmask 130112   ;;  %s340_s18 = sshll.u32 %s489_s9, 5 }
  0x31   : > { %v179_v2 = vld [vmem:[%s158_s29] sm:$0xff]  ;;  %v189_v3 = vadd.f32 %v185_v1, %v181_v0  ;;  %v183_v4 = vld [vmem:[%s158_s29 + $0x8] sm:$0xff]  ;;  %v182_v5 = vld [vmem:[%s158_s29 + $0x30] sm:$0xff]  ;;  %s176_s22 = scalar_lea.vmem [#allocation6], %s338_s16  ;;  %vm229_vm1 = vcmask 1041409   ;;  %vm232_vm2 = vcmask 123904   ;;  %s618_s3 = scalar_lea.hbm %s668_s1, %s340_s18 }
  0x32   : > { %v186_v6 = vld [vmem:[%s158_s29 + $0x38] sm:$0xff]  ;;  %v187_v7 = vadd.f32 %v183_v4, %v179_v2  ;;  %v180_v8 = vld [vmem:[%s158_s29 + $0x10] sm:$0xff]  ;;  %v208_v13 = vand.u32 127, %v207_v12  ;;  %v210_v14 = vshrl.u32 %v207_v12, 7  ;;  %s248_s27 = sshll.u32 %s176_s22, 4  ;;  %s235_s9 = scalar_lea.sflag [#allocation5], %s605_s25  ;;  %s620_s27 = int_to_ptr.vmem [resolvable:$true] %s248_s27 }
  0x33   : > { %v184_v9 = vld [vmem:[%s158_s29 + $0x18] sm:$0xff]  ;;  %195 = vadd.xlane.f32.xlu1 %v189_v3  ;;  %v190_v10 = vadd.f32 %v186_v6, %v182_v5  ;;  %s415_s4 = scalar_lea.vmem %s620_s27, 32  ;;  %s505_s5 = smov [#allocation6]  }
  0x34   : > { %191 = vadd.xlane.f32.xlu0 %v187_v7  ;;  %v188_v11 = vadd.f32 %v184_v9, %v180_v8  ;;  %v213_v15 = vadd.s32 4294967288, %v208_v13  ;;  %v211_v18 = vsub.s32 %v208_v13, %v210_v14  ;;  %p416_p2 = scmp.ne.s32.totalorder %s620_s27, %s415_s4  ;;  %s419_s12 = sshll.u32 %s505_s5, 4  ;;  %s420_s12 = int_to_ptr.vmem [resolvable:$false] %s419_s12 }
  0x35   : > { %s421_s13 = scalar_lea.vmem %s420_s12, 64  ;;  %p422_p5 = scmp.lt.s32.totalorder %s620_s27, %s420_s12 }
  0x36   : > { %v216_v20 = vsub.s32 %v213_v15, %v210_v14  ;;  %p417_p3 = pnand %p416_p2, %p567_p9  ;;  %p423_p6 = scmp.lt.s32.totalorder %s421_s13, %s415_s4 }
  0x37   : > { %197 = vadd.xlane.f32.xlu1 %v190_v10 }
  0x38   : > { %193 = vadd.xlane.f32.xlu0 %v188_v11  ;;  %p418_p4 = pneg %p417_p3  ;;  %p424_p7 = por %p423_p6, %p422_p5 }
  0x3a   : > { %p425_p8 = pnand %p424_p7, %p418_p4 }
  0xc0   : > { %v196_v16 = vpop.xlane.xlu1 %195 }
  0xc1   : > { %v192_v17 = vpop.xlane.xlu0 %191  ;;  %v201_v19 = vmul.f32 0.00390625, %v196_v16 }
  0xc2   : > { %v199_v21 = vmul.f32 0.00390625, %v192_v17 }
  0xc3   : > { %v223_v26 = vrot.slane %v201_v19, %v211_v18 }
  0xc4   : > { %v198_v22 = vpop.xlane.xlu1 %197  ;;  %v212_v28 = vrot.slane %v199_v21, %v211_v18 }
  0xc5   : > { %v202_v23 = vmul.f32 0.00390625, %v198_v22  ;;  %v194_v24 = vpop.xlane.xlu0 %193 }
  0xc6   : > { %v200_v25 = vmul.f32 0.00390625, %v194_v24 }
  0xc7   : > { %v227_v27 = vrot.slane %v202_v23, %v216_v20 }
  0xc8   : > { %v217_v29 = vrot.slane %v200_v25, %v216_v20 }
  0xc9   : > { %v228_v30 = vsel %vm218_vm0, %v227_v27, %v223_v26 }
  0xca   : > { %v219_v31 = vsel %vm218_vm0, %v217_v29, %v212_v28 }
  0xcb   : > { %v230_v32 = vsel %vm229_vm1, %v228_v30, %v219_v31 }
  0xcc   : > { %233 = vst.msk [vmem:[%s176_s22] sm:$0x3] %vm232_vm2, %v230_v32 }
  0xcd   : > { %428 = shalt.err (!%p425_p8)
}
  0xce   : > { %s429_s15 = scalar_lea.hbm %s618_s3, 32  ;;  %s433_s24 = scalar_lea.hbm %s668_s1, 64 }
  0xcf   : > { %p430_p10 = scmp.ne.s32.totalorder %s618_s3, %s429_s15  ;;  %p434_p1 = scmp.lt.u32.totalorder %s618_s3, %s668_s1 }
  0xd0   : > { %p435_p2 = scmp.lt.u32.totalorder %s433_s24, %s429_s15  ;;  %p437_p4 = scmp.lt.u32.totalorder %s429_s15, %s618_s3 }
  0xd1   : > { %p431_p13 = pnand %p430_p10, %p567_p9 }
  0xd2   : > { %p436_p3 = por %p435_p2, %p434_p1 }
  0xd3   : > { %p432_p0 = pneg %p431_p13 }
  0xd4   : > { %p438_p5 = por %p437_p4, %p436_p3 }
  0xd6   : > { %p439_p6 = pnand %p438_p5, %p432_p0 }
  0xd8   : > { %442 = shalt.err (!%p439_p6)
}
  0xd9   : > { %354 = dma.vmem_to_hbm [thread:$0]  (%p567_p9), %s620_s27, 32, %s618_s3, %s235_s9  }
  0xda PF: > { %s260_s28 = sand.u32 1, %s477_s6   ;;  %p357_p7 = pnand %p329_p12, %p574_p11 }
  0xdb   : > { %s261_s29 = scalar_lea.sflag [#allocation5], %s260_s28 }
  0xdc   : > { %472 = dma.done.wait (!%p357_p7), %s261_s29, 32  }
  0xdd   : > { %474 = vsyncadd (!%p357_p7), %s261_s29, 4294967264  ;;  %s17_s11 = sadd.s32 1, %s497_s11   ;;  %s673_s6 = smov %s481_s7 }
  0xde   : > { %p14_p8 = scmp.ge.s32.totalorder %s17_s11, 4   ;;  %s674_s7 = smov %s485_s8 }
  0xdf   : > { %s675_s8 = smov %s572_s20  ;;  %s676_s9 = smov %s493_s10 }
  0xe0   : > { %s677_s10 = smov %s679_s14  ;;  %16 = sbr.rel (!%p14_p8) target bundleno = 6 (0x6), region = 74 }
  0xe7   :  { %266 = vsyncpa [#allocation4], 1 }
  0xe8   :  { %268 = vsyncpa [#allocation4 + $0x1], 1 }
  0xe9   :  { %269 = vsyncpa [#allocation5], 1 }
  0xea   :  { %271 = vsyncpa [#allocation5 + $0x1], 1 }

</bundles_post_ra>
